<compile_context>
chip_gen: v6e
topology: v6e:2x2x1
jax: 0.10.0
libtpu: 0.0.40
codegen_flags: <defaults>
</compile_context>

<pallas_src>
import functools

import jax
import jax.numpy as jnp
from jax.experimental import pallas as pl
from jax.experimental.pallas import tpu as pltpu

HIDDEN1 = 64     # fc1 width
HIDDEN2 = 256    # branch width
SUBLANE = 8

_VMEM_BUDGET = 12 * 1024 * 1024   # conservative: fits v5e's 16 MiB default scoped VMEM


def _round_up(x, m):
    return (x + m - 1) // m * m


# --------------------------------------------------------------------------
# Kernel: three matmuls + two ReLUs.  Weights are VMEM-resident (const maps).
# --------------------------------------------------------------------------
def _dueling_q_kernel(x_ref, w1_ref, b1_ref, wva_ref, bva_ref, wc_ref, bc_ref,
                      q_ref):
    x = x_ref[...]                                                    # (TILE_B, in_dim)

    # fc1 + ReLU
    y = jnp.dot(x, w1_ref[...], preferred_element_type=jnp.float32) + b1_ref[...]
    y = jnp.maximum(y, 0.0)                                           # (TILE_B, 64)

    # Fused value|adv branch: one N=512 matmul + wide bias + ReLU.
    h = jnp.dot(y, wva_ref[...], preferred_element_type=jnp.float32) + bva_ref[...]
    h = jnp.maximum(h, 0.0)                                           # (TILE_B, 512)

    # Entire dueling head (value + centered advantage + biases) as one K=512 matmul.
    q_ref[...] = jnp.dot(h, wc_ref[...], preferred_element_type=jnp.float32) + bc_ref[...]


# --------------------------------------------------------------------------
# One-time parameter fold (hoisted out of the forward).
# --------------------------------------------------------------------------
def prepare_params(params):
    """Fold raw DuelingQNet params into the fused form used by the kernel.

    Call once at init / after every weight update — NOT per forward.
    """
    output_dim = params["wao"].shape[1]

    # Fused value|adv branch weights.
    wva = jnp.concatenate([params["wv"], params["wa"]], axis=1)              # (64, 512)
    bva = jnp.concatenate([params["bv"], params["ba"]], axis=1)              # (1, 512)

    # Dueling head fold:  Q = h @ Wc + bc
    #   value part: wvo broadcast across all output columns
    #   adv   part: column-centered wao (subtracting the per-row column mean)
    wvo_bcast = jnp.broadcast_to(params["wvo"], (HIDDEN2, output_dim))       # (256, out)
    wao_centered = params["wao"] - jnp.mean(params["wao"], axis=1, keepdims=True)
    wc = jnp.concatenate([wvo_bcast, wao_centered], axis=0)                  # (512, out)
    bc = params["bvo"] + params["bao"] - jnp.mean(params["bao"], axis=1, keepdims=True)

    return dict(w1=params["w1"], b1=params["b1"], wva=wva, bva=bva, wc=wc, bc=bc)


def _pick_tile_b(batch, input_dim, out_cols, requested):
    """Derive the batch tile: multiple of 8, VMEM-budgeted, >= 2 grid steps if possible."""
    if batch < SUBLANE:
        return batch                            # block == full batch dim (valid tiling)
    tile = min(requested, _round_up(batch, SUBLANE))

    # Double-buffered x + q tiles must fit the budget (weights are small & resident).
    weight_bytes = 2 * 4 * (input_dim * HIDDEN1 + HIDDEN1
                            + HIDDEN1 * 2 * HIDDEN2 + 2 * HIDDEN2
                            + 2 * HIDDEN2 * out_cols + out_cols)
    per_row_bytes = 2 * 4 * (input_dim + out_cols)
    max_rows = max(SUBLANE, (_VMEM_BUDGET - weight_bytes) // per_row_bytes)
    tile = max(SUBLANE, min(tile, max_rows // SUBLANE * SUBLANE))

    # Keep >= 2 grid steps when the batch allows it (v7x megacore sharding).
    if pl.cdiv(batch, tile) < 2 and batch >= 2 * SUBLANE:
        tile = _round_up(pl.cdiv(batch, 2), SUBLANE)
    return tile


def dueling_q_forward(x, fused, *, tile_b=1024):
    """x: (B, input_dim) float32. fused: output of prepare_params. Returns (B, output_dim)."""
    B, input_dim = x.shape
    out_cols = fused["wc"].shape[1]

    tile = _pick_tile_b(B, input_dim, out_cols, tile_b)
    grid = (pl.cdiv(B, tile),)
    const = lambda i: (0, 0)    # weights: same block every step -> stay VMEM-resident

    return pl.pallas_call(
        _dueling_q_kernel,
        out_shape=jax.ShapeDtypeStruct((B, out_cols), jnp.float32),
        grid=grid,
        in_specs=[
            pl.BlockSpec((tile, input_dim), lambda i: (i, 0)),   # x tile (streams)
            pl.BlockSpec((input_dim, HIDDEN1), const),           # w1
            pl.BlockSpec((1, HIDDEN1), const),                   # b1
            pl.BlockSpec((HIDDEN1, 2 * HIDDEN2), const),         # fused wv|wa
            pl.BlockSpec((1, 2 * HIDDEN2), const),               # fused bv|ba
            pl.BlockSpec((2 * HIDDEN2, out_cols), const),        # folded dueling head weight
            pl.BlockSpec((1, out_cols), const),                  # folded dueling head bias
        ],
        out_specs=pl.BlockSpec((tile, out_cols), lambda i: (i, 0)),
        compiler_params=pltpu.CompilerParams(
            dimension_semantics=("parallel",),                   # megacore on v7x
        ),
    )(x, fused["w1"], fused["b1"], fused["wva"], fused["bva"], fused["wc"], fused["bc"])


# --------------------------------------------------------------------------
# Init + pure-JAX reference (mirrors the PyTorch module exactly).
# --------------------------------------------------------------------------
def init_params(key, input_dim, output_dim):
    """Deterministic synthetic init (PyTorch-like uniform fan-in scaling).

    Weights stored as (in_features, out_features) = transpose of nn.Linear.weight.
    """
    def linear(k, fan_in, fan_out):
        k_w, k_b = jax.random.split(k)
        bound = 1.0 / jnp.sqrt(fan_in)
        w = jax.random.uniform(k_w, (fan_in, fan_out), jnp.float32, -bound, bound)
        b = jax.random.uniform(k_b, (1, fan_out), jnp.float32, -bound, bound)
        return w, b

    k1, k2, k3, k4, k5 = jax.random.split(key, 5)
    w1, b1 = linear(k1, input_dim, HIDDEN1)
    wv, bv = linear(k2, HIDDEN1, HIDDEN2)
    wa, ba = linear(k3, HIDDEN1, HIDDEN2)
    wvo, bvo = linear(k4, HIDDEN2, 1)
    wao, bao = linear(k5, HIDDEN2, output_dim)
    return dict(w1=w1, b1=b1, wv=wv, bv=bv, wa=wa, ba=ba,
                wvo=wvo, bvo=bvo, wao=wao, bao=bao)


def reference_forward(x, p):
    """Pure-JAX reference mirroring the PyTorch forward exactly."""
    y = jax.nn.relu(x @ p["w1"] + p["b1"])
    value = jax.nn.relu(y @ p["wv"] + p["bv"])
    adv = jax.nn.relu(y @ p["wa"] + p["ba"])
    value = value @ p["wvo"] + p["bvo"]
    adv = adv @ p["wao"] + p["bao"]
    adv_avg = jnp.mean(adv, axis=1, keepdims=True)
    return value + adv - adv_avg


if __name__ == "__main__":
    key = jax.random.PRNGKey(0)
    k_x, k_p = jax.random.split(key)

    batch = 2
    input_dim = 16
    output_dim = 8

    x = jax.random.normal(k_x, (batch, input_dim), jnp.float32)
    params = init_params(k_p, input_dim, output_dim)

    fused = prepare_params(params)          # one-time fold (hoisted out of the forward)
    fused = jax.tree_util.tree_map(jax.block_until_ready, fused)

    q = dueling_q_forward(x, fused)
    q = jax.block_until_ready(q)

    q_ref = reference_forward(x, params)
    assert q.shape == (batch, output_dim)
    assert jnp.allclose(q, q_ref, atol=1e-4, rtol=1e-4), "Pallas kernel mismatch vs reference"

    print("KERNEL_OK")
</pallas_src>

<mosaic_0001>
module attributes {stable_mosaic.version = 11 : i64} {
  func.func @_dueling_q_kernel(%arg0: i32, %arg1: memref<2x16xf32, #tpu.memory_space<vmem>>, %arg2: memref<16x64xf32, #tpu.memory_space<vmem>>, %arg3: memref<1x64xf32, #tpu.memory_space<vmem>>, %arg4: memref<64x512xf32, #tpu.memory_space<vmem>>, %arg5: memref<1x512xf32, #tpu.memory_space<vmem>>, %arg6: memref<512x8xf32, #tpu.memory_space<vmem>>, %arg7: memref<1x8xf32, #tpu.memory_space<vmem>>, %arg8: memref<2x8xf32, #tpu.memory_space<vmem>>) attributes {dimension_semantics = [#tpu.dimension_semantics<parallel>], iteration_bounds = array<i64: 1>, scalar_prefetch = 0 : i64, scratch_operands = 0 : i64, tpu.core_type = #tpu.core_type<tc>, window_params = [{transform_indices = @transform_0, window_bounds = array<i64: 2, 16>}, {pipeline_mode = #tpu.pipeline_mode<synchronous>, transform_indices = @transform_1, window_bounds = array<i64: 16, 64>}, {pipeline_mode = #tpu.pipeline_mode<synchronous>, transform_indices = @transform_2, window_bounds = array<i64: 1, 64>}, {pipeline_mode = #tpu.pipeline_mode<synchronous>, transform_indices = @transform_3, window_bounds = array<i64: 64, 512>}, {pipeline_mode = #tpu.pipeline_mode<synchronous>, transform_indices = @transform_4, window_bounds = array<i64: 1, 512>}, {pipeline_mode = #tpu.pipeline_mode<synchronous>, transform_indices = @transform_5, window_bounds = array<i64: 512, 8>}, {pipeline_mode = #tpu.pipeline_mode<synchronous>, transform_indices = @transform_6, window_bounds = array<i64: 1, 8>}, {transform_indices = @transform_7, window_bounds = array<i64: 2, 8>}]} {
    %c0 = arith.constant 0 : index
    %c0_0 = arith.constant 0 : index
    %0 = vector.load %arg1[%c0, %c0_0] : memref<2x16xf32, #tpu.memory_space<vmem>>, vector<2x16xf32>
    %c0_1 = arith.constant 0 : index
    %c0_2 = arith.constant 0 : index
    %1 = vector.load %arg2[%c0_1, %c0_2] : memref<16x64xf32, #tpu.memory_space<vmem>>, vector<16x64xf32>
    %cst = arith.constant dense<0.000000e+00> : vector<2x64xf32>
    %2 = tpu.matmul %0, %1, %cst {dimension_numbers = #tpu.dot_dimension_numbers<[1], [0], [0], [1], [0, 0, 1, 1], [], []>} : vector<2x16xf32>, vector<16x64xf32>, vector<2x64xf32> -> vector<2x64xf32>
    %c0_3 = arith.constant 0 : index
    %c0_4 = arith.constant 0 : index
    %3 = vector.load %arg3[%c0_3, %c0_4] : memref<1x64xf32, #tpu.memory_space<vmem>>, vector<1x64xf32>
    %4 = vector.broadcast %3 : vector<1x64xf32> to vector<2x64xf32>
    %5 = arith.addf %2, %4 : vector<2x64xf32>
    %cst_5 = arith.constant 0.000000e+00 : f32
    %6 = vector.broadcast %cst_5 : f32 to vector<2x64xf32>
    %7 = arith.maximumf %5, %6 : vector<2x64xf32>
    %c0_6 = arith.constant 0 : index
    %c0_7 = arith.constant 0 : index
    %8 = vector.load %arg4[%c0_6, %c0_7] : memref<64x512xf32, #tpu.memory_space<vmem>>, vector<64x512xf32>
    %cst_8 = arith.constant dense<0.000000e+00> : vector<2x512xf32>
    %9 = tpu.matmul %7, %8, %cst_8 {dimension_numbers = #tpu.dot_dimension_numbers<[1], [0], [0], [1], [0, 0, 1, 1], [], []>} : vector<2x64xf32>, vector<64x512xf32>, vector<2x512xf32> -> vector<2x512xf32>
    %c0_9 = arith.constant 0 : index
    %c0_10 = arith.constant 0 : index
    %10 = vector.load %arg5[%c0_9, %c0_10] : memref<1x512xf32, #tpu.memory_space<vmem>>, vector<1x512xf32>
    %11 = vector.broadcast %10 : vector<1x512xf32> to vector<2x512xf32>
    %12 = arith.addf %9, %11 : vector<2x512xf32>
    %cst_11 = arith.constant 0.000000e+00 : f32
    %13 = vector.broadcast %cst_11 : f32 to vector<2x512xf32>
    %14 = arith.maximumf %12, %13 : vector<2x512xf32>
    %c0_12 = arith.constant 0 : index
    %c0_13 = arith.constant 0 : index
    %15 = vector.load %arg6[%c0_12, %c0_13] : memref<512x8xf32, #tpu.memory_space<vmem>>, vector<512x8xf32>
    %cst_14 = arith.constant dense<0.000000e+00> : vector<2x8xf32>
    %16 = tpu.matmul %14, %15, %cst_14 {dimension_numbers = #tpu.dot_dimension_numbers<[1], [0], [0], [1], [0, 0, 1, 1], [], []>} : vector<2x512xf32>, vector<512x8xf32>, vector<2x8xf32> -> vector<2x8xf32>
    %c0_15 = arith.constant 0 : index
    %c0_16 = arith.constant 0 : index
    %17 = vector.load %arg7[%c0_15, %c0_16] : memref<1x8xf32, #tpu.memory_space<vmem>>, vector<1x8xf32>
    %18 = vector.broadcast %17 : vector<1x8xf32> to vector<2x8xf32>
    %19 = arith.addf %16, %18 : vector<2x8xf32>
    %c0_17 = arith.constant 0 : index
    %c0_18 = arith.constant 0 : index
    %20 = vector.load %arg8[%c0_17, %c0_18] : memref<2x8xf32, #tpu.memory_space<vmem>>, vector<2x8xf32>
    tpu.vector_store %arg8[%c0_17, %c0_18], %19 {strides = array<i32>} : memref<2x8xf32, #tpu.memory_space<vmem>>, vector<2x8xf32>,
    return
  }
  func.func @transform_0(%arg0: i32) -> (i32, i32) {
    %c0_i32 = arith.constant 0 : i32
    %c0_i32_0 = arith.constant 0 : i32
    return %arg0, %c0_i32 : i32, i32
  }
  func.func @transform_1(%arg0: i32) -> (i32, i32) {
    %c0_i32 = arith.constant 0 : i32
    %c0_i32_0 = arith.constant 0 : i32
    %c0_i32_1 = arith.constant 0 : i32
    return %c0_i32, %c0_i32_0 : i32, i32
  }
  func.func @transform_2(%arg0: i32) -> (i32, i32) {
    %c0_i32 = arith.constant 0 : i32
    %c0_i32_0 = arith.constant 0 : i32
    %c0_i32_1 = arith.constant 0 : i32
    return %c0_i32, %c0_i32_0 : i32, i32
  }
  func.func @transform_3(%arg0: i32) -> (i32, i32) {
    %c0_i32 = arith.constant 0 : i32
    %c0_i32_0 = arith.constant 0 : i32
    %c0_i32_1 = arith.constant 0 : i32
    return %c0_i32, %c0_i32_0 : i32, i32
  }
  func.func @transform_4(%arg0: i32) -> (i32, i32) {
    %c0_i32 = arith.constant 0 : i32
    %c0_i32_0 = arith.constant 0 : i32
    %c0_i32_1 = arith.constant 0 : i32
    return %c0_i32, %c0_i32_0 : i32, i32
  }
  func.func @transform_5(%arg0: i32) -> (i32, i32) {
    %c0_i32 = arith.constant 0 : i32
    %c0_i32_0 = arith.constant 0 : i32
    %c0_i32_1 = arith.constant 0 : i32
    return %c0_i32, %c0_i32_0 : i32, i32
  }
  func.func @transform_6(%arg0: i32) -> (i32, i32) {
    %c0_i32 = arith.constant 0 : i32
    %c0_i32_0 = arith.constant 0 : i32
    %c0_i32_1 = arith.constant 0 : i32
    return %c0_i32, %c0_i32_0 : i32, i32
  }
  func.func @transform_7(%arg0: i32) -> (i32, i32) {
    %c0_i32 = arith.constant 0 : i32
    %c0_i32_0 = arith.constant 0 : i32
    return %arg0, %c0_i32 : i32, i32
  }
}

</mosaic_0001>

<bundles_post_ra>
// kernel: tpu_custom_call.1
= control target key start
LH: loop header
LB: loop body
LE: loop exit
PB: predicated region body
PF: predicated region fallthrough
CT: control target
= control target key end

     0   :  { %v653_v1 = vmov 0.0   ;;  %vm654_vm0 = vmmov 0   ;;  %vm37_vm1 = vcmask 130048   ;;  %s1005_s0 = inlined_call_operand.vmem [shape: f32[2,16], index: 0, kind: input, shape index: {}]   ;;  %s1006_s1 = inlined_call_operand.vmem [shape: f32[16,64], index: 1, kind: input, shape index: {}]   ;;  %s1007_s2 = inlined_call_operand.vmem [shape: f32[1,64], index: 2, kind: input, shape index: {}]   ;;  %s1008_s3 = inlined_call_operand.vmem [shape: f32[64,512], index: 3, kind: input, shape index: {}]   ;;  %s1009_s4 = inlined_call_operand.vmem [shape: f32[1,512], index: 4, kind: input, shape index: {}]   ;;  %s1010_s5 = inlined_call_operand.vmem [shape: f32[512,8], index: 5, kind: input, shape index: {}]   ;;  %s1011_s6 = inlined_call_operand.vmem [shape: f32[1,8], index: 6, kind: input, shape index: {}]   ;;  %s1012_s7 = inlined_call_operand.hbm [shape: f32[2,8], index: 7, kind: output, shape index: {}]  }
   0x1   :  { %v29_v0 = vld [vmem:[%s1006_s1 + $0x8] sm:$0xff]  ;;  %621 = vmatprep.subr.mxu0 %v653_v1  ;;  %v28_v2 = vld [vmem:[%s1006_s1] sm:$0xff]  ;;  %625 = vmatprep.mubr.msk.f32.mxu0 %vm654_vm0, %v653_v1  ;;  %v143_v6 = vld [vmem:[%s1008_s3 + $0xf8] sm:$0xff] }
   0x2   :  { %v141_v3 = vld [vmem:[%s1008_s3 + $0xe8] sm:$0xff]  ;;  %v140_v4 = vld [vmem:[%s1008_s3 + $0xe0] sm:$0xff]  ;;  %622 = vmatpush3.msra.mxu0 %v29_v0  ;;  %v142_v8 = vld [vmem:[%s1008_s3 + $0xf0] sm:$0xff] }
   0x3   :  { %v27_v5 = vld [vmem:[%s1005_s0] sm:$0x3]  ;;  %186 = vmatprep.subr.mxu1 %v141_v3  ;;  %v137_v7 = vld [vmem:[%s1008_s3 + $0xc8] sm:$0xff]  ;;  %623 = vmatprep.subr.mxu0 %v653_v1  ;;  %v139_v10 = vld [vmem:[%s1008_s3 + $0xd8] sm:$0xff] }
   0x4   :  { %187 = vmatpush1.msra.mxu1 %v140_v4  ;;  %v136_v9 = vld [vmem:[%s1008_s3 + $0xc0] sm:$0xff]  ;;  %624 = vmatpush3.msra.mxu0 %v28_v2  ;;  %v133_v11 = vld [vmem:[%s1008_s3 + $0xa8] sm:$0xff]  ;;  %v138_v12 = vld [vmem:[%s1008_s3 + $0xd0] sm:$0xff] }
   0x5   :  { %188 = vmatprep.subr.mxu1 %v137_v7  ;;  %626 = vmatmul.mubr.msk.f32.vlgmr.msra.gmra.mxu0 %vm37_vm1, %v27_v5  ;;  %v132_v13 = vld [vmem:[%s1008_s3 + $0xa0] sm:$0xff]  ;;  %v135_v14 = vld [vmem:[%s1008_s3 + $0xb8] sm:$0xff]  ;;  %v129_v15 = vld [vmem:[%s1008_s3 + $0x88] sm:$0xff] }
   0x6   :  { %257 = vmatprep.subr.mxu0 %v143_v6  ;;  %189 = vmatpush1.msra.mxu1 %v136_v9  ;;  %v134_v16 = vld [vmem:[%s1008_s3 + $0xb0] sm:$0xff]  ;;  %v128_v17 = vld [vmem:[%s1008_s3 + $0x80] sm:$0xff]  ;;  %v131_v18 = vld [vmem:[%s1008_s3 + $0x98] sm:$0xff] }
   0x7   :  { %258 = vmatpush1.msra.mxu0 %v142_v8  ;;  %190 = vmatprep.subr.mxu1 %v133_v11  ;;  %v125_v19 = vld [vmem:[%s1008_s3 + $0x68] sm:$0xff] }
   0x8   :  { %259 = vmatprep.subr.mxu0 %v139_v10  ;;  %191 = vmatpush1.msra.mxu1 %v132_v13 }
   0x9   :  { %260 = vmatpush1.msra.mxu0 %v138_v12 }
   0xa   :  { %12 = vsyncpa [#allocation3], 0  ;;  %261 = vmatprep.subr.mxu0 %v135_v14  ;;  %192 = vmatprep.subr.mxu1 %v129_v15  ;;  %v130_v20 = vld [vmem:[%s1008_s3 + $0x90] sm:$0xff]  ;;  %v124_v21 = vld [vmem:[%s1008_s3 + $0x60] sm:$0xff]  ;;  %vm166_vm2 = vcmask 523264   ;;  %s655_s17 = smov [#allocation2]  }
   0xb   :  { %262 = vmatpush1.msra.mxu0 %v134_v16  ;;  %193 = vmatpush1.msra.mxu1 %v128_v17  ;;  %v127_v22 = vld [vmem:[%s1008_s3 + $0x78] sm:$0xff]  ;;  %v121_v23 = vld [vmem:[%s1008_s3 + $0x48] sm:$0xff]  ;;  %v126_v24 = vld [vmem:[%s1008_s3 + $0x70] sm:$0xff]  ;;  %s535_s0 = sshll.u32 %s655_s17, 4  ;;  %vm527_vm3 = vcmask 58368   ;;  %s536_s0 = int_to_ptr.vmem [resolvable:$true] %s535_s0 }
   0xc   :  { %263 = vmatprep.subr.mxu0 %v131_v18  ;;  %194 = vmatprep.subr.mxu1 %v125_v19  ;;  %v123_v25 = vld [vmem:[%s1008_s3 + $0x58] sm:$0xff]  ;;  %v120_v26 = vld [vmem:[%s1008_s3 + $0x40] sm:$0xff]  ;;  %v122_v27 = vld [vmem:[%s1008_s3 + $0x50] sm:$0xff]  ;;  %s631_s18 = scalar_lea.vmem %s536_s0, 32  ;;  %p636_p1 = scmp.lt.s32.totalorder %s536_s0, %s536_s0 }
   0xd   :  { %264 = vmatpush1.msra.mxu0 %v130_v20  ;;  %195 = vmatpush1.msra.mxu1 %v124_v21  ;;  %v117_v28 = vld [vmem:[%s1008_s3 + $0x28] sm:$0xff]  ;;  %v119_v29 = vld [vmem:[%s1008_s3 + $0x38] sm:$0xff]  ;;  %v116_v30 = vld [vmem:[%s1008_s3 + $0x20] sm:$0xff]  ;;  %p632_p0 = scmp.ne.s32.totalorder %s536_s0, %s631_s18  ;;  %p637_p2 = scmp.lt.s32.totalorder %s631_s18, %s631_s18 }
   0xe   :  { %265 = vmatprep.subr.mxu0 %v127_v22  ;;  %196 = vmatprep.subr.mxu1 %v121_v23  ;;  %v118_v31 = vld [vmem:[%s1008_s3 + $0x30] sm:$0xff]  ;;  %v113_v32 = vld [vmem:[%s1008_s3 + $0x8] sm:$0xff]  ;;  %v115_v33 = vld [vmem:[%s1008_s3 + $0x18] sm:$0xff] }
   0xf   :  { %266 = vmatpush1.msra.mxu0 %v126_v24  ;;  %234 = vmatprep.mubr.f32.mxu1 %v653_v1  ;;  %v112_v34 = vld [vmem:[%s1008_s3] sm:$0xff]  ;;  %v114_v35 = vld [vmem:[%s1008_s3 + $0x10] sm:$0xff]  ;;  %v347_v36 = vld [vmem:[%s1010_s5 + $0xf8] sm:$0xff]  ;;  %p638_p3 = por %p637_p2, %p636_p1 }
  0x10   :  { %267 = vmatprep.subr.mxu0 %v123_v25  ;;  %305 = vmatprep.mubr.f32.mxu0 %v653_v1  ;;  %v379_v37 = vld [vmem:[%s1010_s5 + $0x1f8] sm:$0xff]  ;;  %v543_v38 = vld [vmem:[%s1007_s2] ss:$0 sm:$0xff]  ;;  %v346_v45 = vld [vmem:[%s1010_s5 + $0xf0] sm:$0xff] }
  0x11   :  { %197 = vmatpush1.msra.mxu1 %v120_v26  ;;  %268 = vmatpush1.msra.mxu0 %v122_v27  ;;  %v331_v43 = vld [vmem:[%s1010_s5 + $0x78] sm:$0xff]  ;;  %v378_v46 = vld [vmem:[%s1010_s5 + $0x1f0] sm:$0xff]  ;;  %v345_v49 = vld [vmem:[%s1010_s5 + $0xe8] sm:$0xff]  ;;  %p639_p4 = pnand %p638_p3, %p632_p0 }
  0x12   :  { %198 = vmatprep.subr.mxu1 %v117_v28  ;;  %269 = vmatprep.subr.mxu0 %v119_v29  ;;  %v363_v44 = vld [vmem:[%s1010_s5 + $0x178] sm:$0xff]  ;;  %v330_v47 = vld [vmem:[%s1010_s5 + $0x70] sm:$0xff]  ;;  %v377_v50 = vld [vmem:[%s1010_s5 + $0x1e8] sm:$0xff] }
  0x13   :  { %199 = vmatpush1.msra.mxu1 %v116_v30  ;;  %270 = vmatpush1.msra.mxu0 %v118_v31  ;;  %v362_v48 = vld [vmem:[%s1010_s5 + $0x170] sm:$0xff]  ;;  %v329_v51 = vld [vmem:[%s1010_s5 + $0x68] sm:$0xff]  ;;  %v344_v53 = vld [vmem:[%s1010_s5 + $0xe0] sm:$0xff] }
  0x14   :  { %200 = vmatprep.subr.mxu1 %v113_v32  ;;  %271 = vmatprep.subr.mxu0 %v115_v33  ;;  %v361_v52 = vld [vmem:[%s1010_s5 + $0x168] sm:$0xff]  ;;  %v376_v54 = vld [vmem:[%s1010_s5 + $0x1e0] sm:$0xff]  ;;  %v343_v57 = vld [vmem:[%s1010_s5 + $0xd8] sm:$0xff] }
  0x15   :  { %201 = vmatpush1.msra.mxu1 %v112_v34  ;;  %272 = vmatpush1.msra.mxu0 %v114_v35  ;;  %v328_v55 = vld [vmem:[%s1010_s5 + $0x60] sm:$0xff]  ;;  %v375_v58 = vld [vmem:[%s1010_s5 + $0x1d8] sm:$0xff]  ;;  %v342_v61 = vld [vmem:[%s1010_s5 + $0xd0] sm:$0xff] }
  0x16   :  { %551 = vmatprep.subr.mxu1 %v347_v36  ;;  %586 = vmatprep.subr.mxu0 %v379_v37  ;;  %v360_v56 = vld [vmem:[%s1010_s5 + $0x160] sm:$0xff]  ;;  %v327_v59 = vld [vmem:[%s1010_s5 + $0x58] sm:$0xff]  ;;  %v374_v62 = vld [vmem:[%s1010_s5 + $0x1d0] sm:$0xff] }
  0x17   :  { %v359_v60 = vld [vmem:[%s1010_s5 + $0x158] sm:$0xff]  ;;  %v326_v63 = vld [vmem:[%s1010_s5 + $0x50] sm:$0xff]  ;;  %v341_v1 = vld [vmem:[%s1010_s5 + $0xc8] sm:$0xff] }
  0x18   :  { %v358_v0 = vld [vmem:[%s1010_s5 + $0x150] sm:$0xff]  ;;  %v373_v2 = vld [vmem:[%s1010_s5 + $0x1c8] sm:$0xff]  ;;  %v340_v5 = vld [vmem:[%s1010_s5 + $0xc0] sm:$0xff] }
  0x19   :  { %v325_v3 = vld [vmem:[%s1010_s5 + $0x48] sm:$0xff]  ;;  %v372_v6 = vld [vmem:[%s1010_s5 + $0x1c0] sm:$0xff]  ;;  %v339_v9 = vld [vmem:[%s1010_s5 + $0xb8] sm:$0xff] }
  0x1a   :  { %v357_v4 = vld [vmem:[%s1010_s5 + $0x148] sm:$0xff]  ;;  %v324_v7 = vld [vmem:[%s1010_s5 + $0x40] sm:$0xff]  ;;  %v371_v10 = vld [vmem:[%s1010_s5 + $0x1b8] sm:$0xff] }
  0x1b   :  { %v356_v8 = vld [vmem:[%s1010_s5 + $0x140] sm:$0xff]  ;;  %v323_v11 = vld [vmem:[%s1010_s5 + $0x38] sm:$0xff]  ;;  %v338_v13 = vld [vmem:[%s1010_s5 + $0xb0] sm:$0xff] }
  0x1c   :  { %v355_v12 = vld [vmem:[%s1010_s5 + $0x138] sm:$0xff]  ;;  %v370_v14 = vld [vmem:[%s1010_s5 + $0x1b0] sm:$0xff]  ;;  %v337_v17 = vld [vmem:[%s1010_s5 + $0xa8] sm:$0xff] }
  0x1d   :  { %v322_v15 = vld [vmem:[%s1010_s5 + $0x30] sm:$0xff]  ;;  %v369_v18 = vld [vmem:[%s1010_s5 + $0x1a8] sm:$0xff]  ;;  %v336_v21 = vld [vmem:[%s1010_s5 + $0xa0] sm:$0xff] }
  0x1e   :  { %v354_v16 = vld [vmem:[%s1010_s5 + $0x130] sm:$0xff]  ;;  %v321_v19 = vld [vmem:[%s1010_s5 + $0x28] sm:$0xff]  ;;  %v368_v22 = vld [vmem:[%s1010_s5 + $0x1a0] sm:$0xff] }
  0x1f   :  { %v353_v20 = vld [vmem:[%s1010_s5 + $0x128] sm:$0xff]  ;;  %v320_v23 = vld [vmem:[%s1010_s5 + $0x20] sm:$0xff]  ;;  %v335_v25 = vld [vmem:[%s1010_s5 + $0x98] sm:$0xff] }
  0x20   :  { %v352_v24 = vld [vmem:[%s1010_s5 + $0x120] sm:$0xff]  ;;  %v367_v26 = vld [vmem:[%s1010_s5 + $0x198] sm:$0xff]  ;;  %v334_v29 = vld [vmem:[%s1010_s5 + $0x90] sm:$0xff] }
  0x21   :  { %v319_v27 = vld [vmem:[%s1010_s5 + $0x18] sm:$0xff]  ;;  %v366_v30 = vld [vmem:[%s1010_s5 + $0x190] sm:$0xff]  ;;  %v333_v33 = vld [vmem:[%s1010_s5 + $0x88] sm:$0xff] }
  0x22   :  { %v351_v28 = vld [vmem:[%s1010_s5 + $0x118] sm:$0xff]  ;;  %v318_v31 = vld [vmem:[%s1010_s5 + $0x10] sm:$0xff]  ;;  %v365_v34 = vld [vmem:[%s1010_s5 + $0x188] sm:$0xff] }
  0x23   :  { %v350_v32 = vld [vmem:[%s1010_s5 + $0x110] sm:$0xff]  ;;  %v317_v35 = vld [vmem:[%s1010_s5 + $0x8] sm:$0xff]  ;;  %v332_v37 = vld [vmem:[%s1010_s5 + $0x80] sm:$0xff] }
  0x24   :  { %v349_v36 = vld [vmem:[%s1010_s5 + $0x108] sm:$0xff] }
  0xc5   :  { %v107_v39 = vpop.f32.mrf.mxu0 }
  0xc6   :  { %v108_v40 = vadd.f32 %v543_v38, %v107_v39  ;;  %v364_v38 = vld [vmem:[%s1010_s5 + $0x180] sm:$0xff] }
  0xc7   :  { %v627_v41 = vpop.f32.mrf.mxu0  ;;  %v316_v39 = vld [vmem:[%s1010_s5] sm:$0xff] }
  0xc8   :  { %v111_v42 = vmax.f32 %v108_v40, 0.0  ;;  %v348_v40 = vld [vmem:[%s1010_s5 + $0x100] sm:$0xff]  ;;  %v146_v41 = vlaneseq }
  0xca   :  { %545 = vmatmul.mubr.msk.f32.vlgmr.msra.gmra.mxu1 %vm166_vm2, %v111_v42  ;;  %546 = vmatmul.mubr.msk.f32.vlgmr.msra.gmra.mxu0 %vm166_vm2, %v111_v42  ;;  %v147_v42 = vshrl.u32 %v146_v41, 7 }
  0xcb   :  { %552 = vmatpush3.msra.mxu1 %v331_v43  ;;  %587 = vmatpush3.msra.mxu0 %v363_v44 }
  0xcc   :  { %553 = vmatprep.subr.mxu1 %v346_v45  ;;  %588 = vmatprep.subr.mxu0 %v378_v46  ;;  %v148_v43 = vsub.s32 0, %v147_v42  ;;  %v156_v44 = vsub.s32 2, %v147_v42  ;;  %v144_v45 = vld [vmem:[%s1009_s4] sm:$0xf]  ;;  %v152_v46 = vsub.s32 1, %v147_v42 }
  0xcd   :  { %554 = vmatpush3.msra.mxu1 %v330_v47  ;;  %589 = vmatpush3.msra.mxu0 %v362_v48  ;;  %v160_v47 = vsub.s32 3, %v147_v42 }
  0xce   :  { %555 = vmatprep.subr.mxu1 %v345_v49  ;;  %590 = vmatprep.subr.mxu0 %v377_v50  ;;  %v149_v48 = vrot.slane %v144_v45, %v148_v43  ;;  %v157_v49 = vrot.slane %v144_v45, %v156_v44  ;;  %v153_v50 = vrot.slane %v144_v45, %v152_v46 }
  0xcf   :  { %556 = vmatpush3.msra.mxu1 %v329_v51  ;;  %591 = vmatpush3.msra.mxu0 %v361_v52  ;;  %v161_v51 = vrot.slane %v144_v45, %v160_v47 }
  0xd0   :  { %557 = vmatprep.subr.mxu1 %v344_v53  ;;  %592 = vmatprep.subr.mxu0 %v376_v54 }
  0xd1   :  { %558 = vmatpush3.msra.mxu1 %v328_v55  ;;  %593 = vmatpush3.msra.mxu0 %v360_v56 }
  0xd2   :  { %559 = vmatprep.subr.mxu1 %v343_v57  ;;  %594 = vmatprep.subr.mxu0 %v375_v58 }
  0xd3   :  { %560 = vmatpush3.msra.mxu1 %v327_v59  ;;  %595 = vmatpush3.msra.mxu0 %v359_v60 }
  0xd4   :  { %561 = vmatprep.subr.mxu1 %v342_v61  ;;  %596 = vmatprep.subr.mxu0 %v374_v62 }
  0xd5   :  { %562 = vmatpush3.msra.mxu1 %v326_v63  ;;  %597 = vmatpush3.msra.mxu0 %v358_v0 }
  0xd6   :  { %563 = vmatprep.subr.mxu1 %v341_v1  ;;  %598 = vmatprep.subr.mxu0 %v373_v2  ;;  %v547_v2 = vld [vmem:[%s1011_s6] ss:$0 sm:$0xff] }
  0xd7   :  { %564 = vmatpush3.msra.mxu1 %v325_v3  ;;  %599 = vmatpush3.msra.mxu0 %v357_v4 }
  0xd8   :  { %565 = vmatprep.subr.mxu1 %v340_v5  ;;  %600 = vmatprep.subr.mxu0 %v372_v6 }
  0xd9   :  { %566 = vmatpush3.msra.mxu1 %v324_v7  ;;  %601 = vmatpush3.msra.mxu0 %v356_v8 }
  0xda   :  { %567 = vmatprep.subr.mxu1 %v339_v9  ;;  %602 = vmatprep.subr.mxu0 %v371_v10 }
  0xdb   :  { %568 = vmatpush3.msra.mxu1 %v323_v11  ;;  %603 = vmatpush3.msra.mxu0 %v355_v12 }
  0xdc   :  { %569 = vmatprep.subr.mxu1 %v338_v13  ;;  %604 = vmatprep.subr.mxu0 %v370_v14 }
  0xdd   :  { %570 = vmatpush3.msra.mxu1 %v322_v15  ;;  %605 = vmatpush3.msra.mxu0 %v354_v16 }
  0xde   :  { %571 = vmatprep.subr.mxu1 %v337_v17  ;;  %606 = vmatprep.subr.mxu0 %v369_v18 }
  0xdf   :  { %572 = vmatpush3.msra.mxu1 %v321_v19  ;;  %607 = vmatpush3.msra.mxu0 %v353_v20 }
  0xe0   :  { %573 = vmatprep.subr.mxu1 %v336_v21  ;;  %608 = vmatprep.subr.mxu0 %v368_v22 }
  0xe1   :  { %574 = vmatpush3.msra.mxu1 %v320_v23  ;;  %609 = vmatpush3.msra.mxu0 %v352_v24 }
  0xe2   :  { %575 = vmatprep.subr.mxu1 %v335_v25  ;;  %610 = vmatprep.subr.mxu0 %v367_v26 }
  0xe3   :  { %576 = vmatpush3.msra.mxu1 %v319_v27  ;;  %611 = vmatpush3.msra.mxu0 %v351_v28 }
  0xe4   :  { %577 = vmatprep.subr.mxu1 %v334_v29  ;;  %612 = vmatprep.subr.mxu0 %v366_v30 }
  0xe5   :  { %578 = vmatpush3.msra.mxu1 %v318_v31  ;;  %613 = vmatpush3.msra.mxu0 %v350_v32 }
  0xe6   :  { %579 = vmatprep.subr.mxu1 %v333_v33  ;;  %614 = vmatprep.subr.mxu0 %v365_v34 }
  0xe7   :  { %580 = vmatpush3.msra.mxu1 %v317_v35  ;;  %615 = vmatpush3.msra.mxu0 %v349_v36 }
  0xe8   :  { %581 = vmatprep.subr.mxu1 %v332_v37  ;;  %616 = vmatprep.subr.mxu0 %v364_v38 }
  0xe9   :  { %582 = vmatpush3.msra.mxu1 %v316_v39  ;;  %617 = vmatpush3.msra.mxu0 %v348_v40 }
 0x18a   :  { %v236_v52 = vpop.f32.mrf.mxu1  ;;  %v307_v53 = vpop.f32.mrf.mxu0 }
 0x18b   :  { %v237_v54 = vadd.f32 %v236_v52, %v149_v48  ;;  %v308_v55 = vadd.f32 %v307_v53, %v157_v49 }
 0x18c   :  { %v238_v56 = vpop.f32.mrf.mxu1  ;;  %v309_v57 = vpop.f32.mrf.mxu0 }
 0x18d   :  { %v239_v58 = vadd.f32 %v238_v56, %v153_v50  ;;  %v310_v59 = vadd.f32 %v309_v57, %v161_v51  ;;  %v312_v62 = vmax.f32 %v237_v54, 0.0  ;;  %v314_v63 = vmax.f32 %v308_v55, 0.0 }
 0x18f   :  { %v313_v60 = vmax.f32 %v239_v58, 0.0  ;;  %v315_v61 = vmax.f32 %v310_v59, 0.0 }
 0x191   :  { %451 = vmatprep.mubr.f32.mxu1 %v313_v60  ;;  %521 = vmatprep.mubr.f32.mxu0 %v315_v61 }
 0x192   :  { %452 = vmatmul.mubr.f32.vlgmr.msra.gmra.mxu1 %v312_v62  ;;  %522 = vmatmul.mubr.f32.vlgmr.msra.gmra.mxu0 %v314_v63 }
 0x252   :  { %v583_v0 = vpop.f32.mrf.mxu1  ;;  %v618_v1 = vpop.f32.mrf.mxu0 }
 0x254   :  { %v584_v3 = vpop.f32.mrf.mxu1  ;;  %v619_v4 = vpop.f32.mrf.mxu0 }
 0x255   :  { %v585_v5 = vadd.f32 %v584_v3, %v583_v0  ;;  %v620_v7 = vadd.f32 %v619_v4, %v618_v1 }
 0x257   :  { %v454_v6 = vadd.f32 %v585_v5, %v547_v2 }
 0x259   :  { %v524_v8 = vadd.f32 %v620_v7, %v454_v6 }
 0x25b   :  { %528 = vst.msk [vmem:[#allocation2] sm:$0x3] %vm527_vm3, %v524_v8 }
 0x25c   :  { %642 = shalt.err (!%p639_p4)
}
 0x25d   :  { %538 = dma.vmem_to_hbm [thread:$0]  %s536_s0, 32, %s1012_s7, [#allocation3]  }
 0x25e   :  { %651 = dma.done.wait [#allocation3], 32  }
 0x25f   :  { %652 = vsyncadd [#allocation3], 4294967264 }
 0x260   :  { %542 = vsyncpa [#allocation3], 1 }

</bundles_post_ra>
